<compile_context>
chip_gen: v5e
topology: v5e:2x2
jax: 0.10.0
libtpu: 0.0.40
codegen_flags: <defaults>
</compile_context>

<pallas_src>
import jax
import jax.numpy as jnp
from jax.experimental import pallas as pl
from jax.experimental.pallas import tpu as pltpu


def _num_tensorcores():
    """Best-effort TensorCores-per-chip. v7x has 2 TCs and benefits from
    forcing nb >= 2; single-TC v5e/v6e prefer nb == 1 (largest batch tile)."""
    try:
        kind = jax.devices()[0].device_kind.lower()
    except Exception:
        return 1
    return 2 if ("v7" in kind or "7x" in kind) else 1


def _make_kernel(hw_total, thw, nk, bt):
    """hw_total: H*W (static). thw: spatial tile (static). nk: # spatial tiles.
    bt: batch tile (static)."""
    needs_mask = (hw_total % thw) != 0
    inv_hw = 1.0 / float(hw_total)
    last_base = (nk - 1) * thw

    def kernel(x_ref, w1t_ref, w2t_ref, o_ref, acc_ref):
        # x_ref: (Bt, C, thw)   w1t_ref: (C, Ch)   w2t_ref: (Ch, C)
        # o_ref: (Bt, C)        acc_ref: (2*Bt, C) f32 [sum rows | max rows]
        k = pl.program_id(1)
        c = acc_ref.shape[1]

        @pl.when(k == 0)
        def _init():
            acc_ref[0:bt, :] = jnp.zeros((bt, c), jnp.float32)
            acc_ref[bt:2 * bt, :] = jnp.full((bt, c), -jnp.inf, jnp.float32)

        # Single load feeds BOTH reductions (one pass over the tile).
        x = x_ref[...].astype(jnp.float32)                       # (Bt, C, thw)

        def accumulate(x_sum, x_max):
            acc_ref[0:bt, :] = acc_ref[0:bt, :] + jnp.sum(x_sum, axis=-1)
            acc_ref[bt:2 * bt, :] = jnp.maximum(
                acc_ref[bt:2 * bt, :], jnp.max(x_max, axis=-1))

        if not needs_mask:
            # Hot path: cast + add + max only, every tile.
            accumulate(x, x)
        else:
            # Mask hoisted out of the streaming loop: only the final (ragged)
            # tile pays for iota/compare/select.
            if nk > 1:
                @pl.when(k < nk - 1)
                def _hot():
                    accumulate(x, x)

            @pl.when(k == nk - 1)
            def _tail():
                pos = last_base + jax.lax.broadcasted_iota(
                    jnp.int32, (1, 1, thw), 2)
                valid = pos < hw_total                           # (1, 1, thw)
                accumulate(jnp.where(valid, x, 0.0),
                           jnp.where(valid, x, -jnp.inf))

        @pl.when(k == nk - 1)
        def _finalize():
            # Fused operand: [sum rows ; max rows] already contiguous in VMEM.
            pooled = acc_ref[...]                                # (2*Bt, C)
            row = jax.lax.broadcasted_iota(jnp.int32, (2 * bt, 1), 0)
            pooled = pooled * jnp.where(row < bt, inv_hw, 1.0)   # avg rows scaled
            h = jnp.maximum(
                jnp.dot(pooled, w1t_ref[...],
                        preferred_element_type=jnp.float32), 0.0)  # (2*Bt, Ch)
            y = jnp.dot(h, w2t_ref[...],
                        preferred_element_type=jnp.float32)         # (2*Bt, C)
            o_ref[...] = jax.nn.sigmoid(
                y[0:bt, :] + y[bt:2 * bt, :]).astype(o_ref.dtype)

    return kernel


def channel_attention(x, w1, w2, hw_tile=None):
    """x: (B, C, H, W); w1: (C//16, C); w2: (C, C//16). Returns (B, C, 1, 1)."""
    B, C, H, W = x.shape
    Ch = w1.shape[0]
    HW = H * W
    dtype_bytes = jnp.dtype(x.dtype).itemsize

    # --- VMEM budget: scoped limit is the single source of truth ------------
    try:
        vmem_cap = int(pltpu.get_tpu_info().vmem_capacity_bytes)
    except Exception:
        vmem_cap = 64 << 20  # conservative fallback (v7x per-TC VMEM)
    vmem_limit = min((vmem_cap * 3) // 4, 100 << 20)   # 96 MiB v5e/v6e, 48 MiB v7x
    n_x_buffers = 2                                    # default double buffering
    per_buf_budget = max(vmem_limit // (n_x_buffers + 1), 1 << 20)

    # --- batch tile: decoupled from the output block, so any divisor of B ---
    cores = _num_tensorcores()
    divisors = sorted((d for d in range(1, B + 1) if B % d == 0), reverse=True)
    if cores > 1 and B >= cores:
        # v7x: make nb a multiple of the TC count so megacore actually shards.
        cands = [d for d in divisors if (B // d) % cores == 0] or divisors
    else:
        # Single TC: prefer nb == 1 (largest Bt that fits).
        cands = divisors
    # TODO(synk): for B == 1 on v7x, split the HW reduction across two
    # batch-axis pseudo-blocks and combine to use both TensorCores.

    full_fit = [d for d in cands if d * C * HW * dtype_bytes <= per_buf_budget]
    if full_fit:
        Bt = full_fit[0]            # largest batch tile whose full-HW block fits
    else:
        Bt = cands[-1]              # smallest batch tile; HW gets tiled below

    # --- spatial tile: full HW (contiguous HBM read) if it fits, else *128 --
    if hw_tile is not None:
        thw = min(int(hw_tile), HW)
    else:
        max_thw = per_buf_budget // max(Bt * C * dtype_bytes, 1)
        thw = HW if HW <= max_thw else max((max_thw // 128) * 128, 128)

    nb = B // Bt
    nk = pl.cdiv(HW, thw)

    x_flat = x.reshape(B, C, HW)
    w1t = jnp.asarray(w1).T          # (C, Ch)  : 1x1 conv C  -> Ch
    w2t = jnp.asarray(w2).T          # (Ch, C)  : 1x1 conv Ch -> C
    w_bytes = (w1t.size + w2t.size) * jnp.dtype(w1t.dtype).itemsize

    cost = pl.CostEstimate(
        flops=int(2 * B * C * HW + 8 * B * C * Ch),
        transcendentals=int(B * C),
        bytes_accessed=int(B * C * HW * dtype_bytes + w_bytes
                           + B * C * dtype_bytes),
    )

    out = pl.pallas_call(
        _make_kernel(HW, thw, nk, Bt),
        out_shape=jax.ShapeDtypeStruct((nb, Bt, C), x.dtype),
        grid_spec=pltpu.PrefetchScalarGridSpec(
            num_scalar_prefetch=0,
            grid=(nb, nk),
            in_specs=[
                pl.BlockSpec((Bt, C, thw), lambda b, k: (b, 0, k)),
                pl.BlockSpec((C, Ch), lambda b, k: (0, 0)),
                pl.BlockSpec((Ch, C), lambda b, k: (0, 0)),
            ],
            # Output block indexed only by the batch tile; (None, Bt, C) makes
            # the last two block dims equal the full array dims, so Bt is free
            # of the (8,128) constraint (key enabler for Bt=1 on v7x megacore).
            out_specs=pl.BlockSpec((None, Bt, C), lambda b, k: (b, 0, 0)),
            scratch_shapes=[
                pltpu.VMEM((2 * Bt, C), jnp.float32),   # fused [sum ; max] acc
            ],
        ),
        compiler_params=pltpu.CompilerParams(
            dimension_semantics=("parallel", "arbitrary"),
            vmem_limit_bytes=int(vmem_limit),
        ),
        cost_estimate=cost,
    )(x_flat, w1t, w2t)

    return out.reshape(B, C, 1, 1)


def channel_attention_ref(x, w1, w2):
    avg = x.mean(axis=(2, 3))                                # (B, C)
    mx = x.max(axis=(2, 3))                                  # (B, C)

    def fc(v):
        return jnp.maximum(v @ w1.T, 0.0) @ w2.T

    out = jax.nn.sigmoid(fc(avg) + fc(mx))
    return out.reshape(x.shape[0], x.shape[1], 1, 1)


if __name__ == "__main__":
    B, C, H, W = 2, 32, 16, 16          # in_planes=32 -> hidden = 32 // 16 = 2
    Ch = C // 16

    key = jax.random.PRNGKey(0)
    kx, k1, k2 = jax.random.split(key, 3)

    x = jax.random.normal(kx, (B, C, H, W), dtype=jnp.float32)
    # 1x1 conv kernels (out, in, 1, 1) squeezed to dense matrices.
    w1 = jax.random.normal(k1, (Ch, C), dtype=jnp.float32) * (2.0 / C) ** 0.5
    w2 = jax.random.normal(k2, (C, Ch), dtype=jnp.float32) * (2.0 / Ch) ** 0.5

    # Default path: whole-HW contiguous tile (single reduction step).
    out = jax.block_until_ready(channel_attention(x, w1, w2))
    ref = channel_attention_ref(x, w1, w2)
    assert out.shape == (B, C, 1, 1)
    assert jnp.allclose(out, ref, atol=1e-5, rtol=1e-5), "mismatch vs reference"

    # Tiled-reduction accumulator path (HW=256 split into 2 unmasked tiles).
    out_tiled = jax.block_until_ready(channel_attention(x, w1, w2, hw_tile=128))
    assert jnp.allclose(out_tiled, ref, atol=1e-5, rtol=1e-5), "tiled mismatch"

    # Masked ragged-tail path (HW=324, tiles of 128 -> mask only on last tile).
    x2 = jax.random.normal(jax.random.PRNGKey(1), (B, C, 18, 18), dtype=jnp.float32)
    out_masked = jax.block_until_ready(channel_attention(x2, w1, w2, hw_tile=128))
    ref_masked = channel_attention_ref(x2, w1, w2)
    assert jnp.allclose(out_masked, ref_masked, atol=1e-5, rtol=1e-5), "masked mismatch"

    print("KERNEL_OK")
</pallas_src>

<mosaic_0001>
module attributes {stable_mosaic.version = 11 : i64} {
  func.func @kernel(%arg0: i32, %arg1: i32, %arg2: memref<2x32x256xf32, #tpu.memory_space<vmem>>, %arg3: memref<32x2xf32, #tpu.memory_space<vmem>>, %arg4: memref<2x32xf32, #tpu.memory_space<vmem>>, %arg5: memref<1x2x32xf32, #tpu.memory_space<vmem>>, %arg6: memref<4x32xf32, #tpu.memory_space<vmem>>) attributes {dimension_semantics = [#tpu.dimension_semantics<parallel>, #tpu.dimension_semantics<arbitrary>], iteration_bounds = array<i64: 1, 1>, scalar_prefetch = 0 : i64, scratch_operands = 1 : i64, tpu.core_type = #tpu.core_type<tc>, window_params = [{transform_indices = @transform_0, window_bounds = array<i64: 2, 32, 256>}, {pipeline_mode = #tpu.pipeline_mode<synchronous>, transform_indices = @transform_1, window_bounds = array<i64: 32, 2>}, {pipeline_mode = #tpu.pipeline_mode<synchronous>, transform_indices = @transform_2, window_bounds = array<i64: 2, 32>}, {transform_indices = @transform_3, window_bounds = array<i64: 1, 2, 32>}]} {
    %c0_i32 = arith.constant 0 : i32
    %0 = arith.cmpi eq, %arg1, %c0_i32 : i32
    %1 = arith.extui %0 : i1 to i32
    %c0_i32_0 = arith.constant 0 : i32
    %2 = arith.cmpi ne, %1, %c0_i32_0 : i32
    scf.if %2 {
      %cst_13 = arith.constant 0.000000e+00 : f32
      %15 = vector.broadcast %cst_13 : f32 to vector<2x32xf32>
      %c0_14 = arith.constant 0 : index
      %c0_15 = arith.constant 0 : index
      %16 = vector.load %arg6[%c0_14, %c0_15] : memref<4x32xf32, #tpu.memory_space<vmem>>, vector<2x32xf32>
      tpu.vector_store %arg6[%c0_14, %c0_15], %15 {strides = array<i32>} : memref<4x32xf32, #tpu.memory_space<vmem>>, vector<2x32xf32>,
      %cst_16 = arith.constant 0xFF800000 : f32
      %17 = vector.broadcast %cst_16 : f32 to vector<2x32xf32>
      %c2_17 = arith.constant 2 : index
      %c0_18 = arith.constant 0 : index
      %18 = vector.load %arg6[%c2_17, %c0_18] : memref<4x32xf32, #tpu.memory_space<vmem>>, vector<2x32xf32>
      tpu.vector_store %arg6[%c2_17, %c0_18], %17 {strides = array<i32>} : memref<4x32xf32, #tpu.memory_space<vmem>>, vector<2x32xf32>,
    } else {
    }
    %c0 = arith.constant 0 : index
    %c0_1 = arith.constant 0 : index
    %c0_2 = arith.constant 0 : index
    %3 = vector.load %arg2[%c0, %c0_1, %c0_2] : memref<2x32x256xf32, #tpu.memory_space<vmem>>, vector<2x32x256xf32>
    %c0_3 = arith.constant 0 : index
    %c0_4 = arith.constant 0 : index
    %4 = vector.load %arg6[%c0_3, %c0_4] : memref<4x32xf32, #tpu.memory_space<vmem>>, vector<2x32xf32>
    %cst = arith.constant dense<0.000000e+00> : vector<2x32xf32>
    %5 = vector.multi_reduction <add>, %3, %cst [2] : vector<2x32x256xf32> to vector<2x32xf32>
    %6 = arith.addf %4, %5 : vector<2x32xf32>
    %c0_5 = arith.constant 0 : index
    %c0_6 = arith.constant 0 : index
    %7 = vector.load %arg6[%c0_5, %c0_6] : memref<4x32xf32, #tpu.memory_space<vmem>>, vector<2x32xf32>
    tpu.vector_store %arg6[%c0_5, %c0_6], %6 {strides = array<i32>} : memref<4x32xf32, #tpu.memory_space<vmem>>, vector<2x32xf32>,
    %c2 = arith.constant 2 : index
    %c0_7 = arith.constant 0 : index
    %8 = vector.load %arg6[%c2, %c0_7] : memref<4x32xf32, #tpu.memory_space<vmem>>, vector<2x32xf32>
    %cst_8 = arith.constant dense<0xFF800000> : vector<2x32xf32>
    %9 = vector.multi_reduction <maximumf>, %3, %cst_8 [2] : vector<2x32x256xf32> to vector<2x32xf32>
    %10 = arith.maximumf %8, %9 : vector<2x32xf32>
    %c2_9 = arith.constant 2 : index
    %c0_10 = arith.constant 0 : index
    %11 = vector.load %arg6[%c2_9, %c0_10] : memref<4x32xf32, #tpu.memory_space<vmem>>, vector<2x32xf32>
    tpu.vector_store %arg6[%c2_9, %c0_10], %10 {strides = array<i32>} : memref<4x32xf32, #tpu.memory_space<vmem>>, vector<2x32xf32>,
    %c0_i32_11 = arith.constant 0 : i32
    %12 = arith.cmpi eq, %arg1, %c0_i32_11 : i32
    %13 = arith.extui %12 : i1 to i32
    %c0_i32_12 = arith.constant 0 : i32
    %14 = arith.cmpi ne, %13, %c0_i32_12 : i32
    scf.if %14 {
      %c0_13 = arith.constant 0 : index
      %c0_14 = arith.constant 0 : index
      %15 = vector.load %arg6[%c0_13, %c0_14] : memref<4x32xf32, #tpu.memory_space<vmem>>, vector<4x32xf32>
      %16 = tpu.iota {dimensions = array<i32: 0>} : vector<4x1xi32>
      %c2_i32 = arith.constant 2 : i32
      %17 = vector.broadcast %c2_i32 : i32 to vector<4x1xi32>
      %18 = arith.cmpi slt, %16, %17 : vector<4x1xi32>
      %cst_15 = arith.constant 3.906250e-03 : f32
      %cst_16 = arith.constant 1.000000e+00 : f32
      %19 = vector.broadcast %cst_15 : f32 to vector<4x1xf32>
      %20 = vector.broadcast %cst_16 : f32 to vector<4x1xf32>
      %21 = arith.select %18, %19, %20 : vector<4x1xi1>, vector<4x1xf32>
      %22 = vector.broadcast %21 : vector<4x1xf32> to vector<4x32xf32>
      %23 = arith.mulf %15, %22 : vector<4x32xf32>
      %c0_17 = arith.constant 0 : index
      %c0_18 = arith.constant 0 : index
      %24 = vector.load %arg3[%c0_17, %c0_18] : memref<32x2xf32, #tpu.memory_space<vmem>>, vector<32x2xf32>
      %cst_19 = arith.constant dense<0.000000e+00> : vector<4x2xf32>
      %25 = tpu.matmul %23, %24, %cst_19 {dimension_numbers = #tpu.dot_dimension_numbers<[1], [0], [0], [1], [0, 0, 1, 1], [], []>} : vector<4x32xf32>, vector<32x2xf32>, vector<4x2xf32> -> vector<4x2xf32>
      %cst_20 = arith.constant 0.000000e+00 : f32
      %26 = vector.broadcast %cst_20 : f32 to vector<4x2xf32>
      %27 = arith.maximumf %25, %26 : vector<4x2xf32>
      %c0_21 = arith.constant 0 : index
      %c0_22 = arith.constant 0 : index
      %28 = vector.load %arg4[%c0_21, %c0_22] : memref<2x32xf32, #tpu.memory_space<vmem>>, vector<2x32xf32>
      %cst_23 = arith.constant dense<0.000000e+00> : vector<4x32xf32>
      %29 = tpu.matmul %27, %28, %cst_23 {dimension_numbers = #tpu.dot_dimension_numbers<[1], [0], [0], [1], [0, 0, 1, 1], [], []>} : vector<4x2xf32>, vector<2x32xf32>, vector<4x32xf32> -> vector<4x32xf32>
      %30 = vector.extract_strided_slice %29 {offsets = [0, 0], sizes = [2, 32], strides = [1, 1]} : vector<4x32xf32> to vector<2x32xf32>
      %31 = vector.extract_strided_slice %29 {offsets = [2, 0], sizes = [2, 32], strides = [1, 1]} : vector<4x32xf32> to vector<2x32xf32>
      %32 = arith.addf %30, %31 : vector<2x32xf32>
      %33 = arith.negf %32 : vector<2x32xf32>
      %34 = math.exp %33 : vector<2x32xf32>
      %cst_24 = arith.constant 1.000000e+00 : f32
      %35 = vector.broadcast %cst_24 : f32 to vector<2x32xf32>
      %36 = arith.addf %35, %34 : vector<2x32xf32>
      %37 = arith.divf %35, %36 : vector<2x32xf32>
      %c0_25 = arith.constant 0 : index
      %c0_26 = arith.constant 0 : index
      %c0_27 = arith.constant 0 : index
      %38 = vector.load %arg5[%c0_25, %c0_26, %c0_27] : memref<1x2x32xf32, #tpu.memory_space<vmem>>, vector<1x2x32xf32>
      %39 = vector.shape_cast %38 : vector<1x2x32xf32> to vector<2x32xf32>
      %40 = vector.shape_cast %37 : vector<2x32xf32> to vector<1x2x32xf32>
      tpu.vector_store %arg5[%c0_25, %c0_26, %c0_27], %40 {strides = array<i32>} : memref<1x2x32xf32, #tpu.memory_space<vmem>>, vector<1x2x32xf32>,
    } else {
    }
    return
  }
  func.func @transform_0(%arg0: i32, %arg1: i32) -> (i32, i32, i32) {
    %c0_i32 = arith.constant 0 : i32
    %c0_i32_0 = arith.constant 0 : i32
    return %arg0, %c0_i32, %arg1 : i32, i32, i32
  }
  func.func @transform_1(%arg0: i32, %arg1: i32) -> (i32, i32) {
    %c0_i32 = arith.constant 0 : i32
    %c0_i32_0 = arith.constant 0 : i32
    %c0_i32_1 = arith.constant 0 : i32
    return %c0_i32, %c0_i32_0 : i32, i32
  }
  func.func @transform_2(%arg0: i32, %arg1: i32) -> (i32, i32) {
    %c0_i32 = arith.constant 0 : i32
    %c0_i32_0 = arith.constant 0 : i32
    %c0_i32_1 = arith.constant 0 : i32
    return %c0_i32, %c0_i32_0 : i32, i32
  }
  func.func @transform_3(%arg0: i32, %arg1: i32) -> (i32, i32, i32) {
    %c0_i32 = arith.constant 0 : i32
    %c0_i32_0 = arith.constant 0 : i32
    %c0_i32_1 = arith.constant 0 : i32
    return %arg0, %c0_i32, %c0_i32_0 : i32, i32, i32
  }
}

</mosaic_0001>

<bundles_post_ra>
// kernel: tpu_custom_call.1
= control target key start
LH: loop header
LB: loop body
LE: loop exit
PB: predicated region body
PF: predicated region fallthrough
CT: control target
= control target key end

     0   :  { %8 = vsyncpa [#allocation4], 0  ;;  %s408_s0 = inlined_call_operand.hbm [shape: f32[2,32,256], index: 0, kind: input, shape index: {}]   ;;  %s409_s1 = inlined_call_operand.vmem [shape: f32[32,2], index: 1, kind: input, shape index: {}]   ;;  %s410_s2 = inlined_call_operand.vmem [shape: f32[2,32], index: 2, kind: input, shape index: {}]   ;;  %s411_s3 = inlined_call_operand.hbm [shape: f32[1,2,32], index: 3, kind: output, shape index: {}]  }
   0x1   :  { %9 = vsyncpa [#allocation5], 0  ;;  %s14_s14 = sshll.u32 %s408_s0, 4  ;;  %s341_s15 = smov [#allocation3]   ;;  %s15_s14 = int_to_ptr.hbm [resolvable:$true] %s14_s14 }
   0x2   :  { %s16_s16 = sshll.u32 %s341_s15, 4  ;;  %s342_s17 = smov 256   ;;  %s17_s16 = int_to_ptr.vmem [resolvable:$true] %s16_s16 }
   0x3   :  { %s343_s18 = smov 16  }
   0x4   :  { %22 = dma.hbm_to_vmem [thread:$0]  %s15_s14, 2048, %s17_s16, [#allocation4], %s342_s17, %s342_s17, %s343_s18  }
   0x5   :  { %337 = dma.done.wait [#allocation4], 2048  }
   0x6   :  { %338 = vsyncadd [#allocation4], 4294965248  ;;  %v46_v0 = vld [vmem:[#allocation3 + $0x40] sm:$0xff]  ;;  %v47_v1 = vld [vmem:[#allocation3 + $0x48] sm:$0xff]  ;;  %vm35_vm0 = vcmask 254976   ;;  %v344_v32 = vmov 0.0   ;;  %v87_v46 = vlaneseq }
   0x7   :  { %v38_v2 = vld [vmem:[#allocation3] sm:$0xff]  ;;  %v67_v3 = vadd.f32 %v47_v1, %v46_v0  ;;  %v39_v4 = vld [vmem:[#allocation3 + $0x8] sm:$0xff]  ;;  %v48_v7 = vld [vmem:[#allocation3 + $0x50] sm:$0xff]  ;;  %v128_v18 = vmax.f32 %v46_v0, %v47_v1  ;;  %36 = vst.msk [vmem:[#allocation2] sm:$0x3] %vm35_vm0, %v344_v32  ;;  %v345_v36 = vmov -inf  }
   0x8   :  { %v116_v5 = vmax.f32 %v38_v2, %v39_v4  ;;  %v55_v6 = vadd.f32 %v39_v4, %v38_v2  ;;  %v49_v8 = vld [vmem:[#allocation3 + $0x58] sm:$0xff]  ;;  %v40_v9 = vld [vmem:[#allocation3 + $0x10] sm:$0xff]  ;;  %v42_v14 = vld [vmem:[#allocation3 + $0x20] sm:$0xff]  ;;  %37 = vst.msk [vmem:[#allocation2 + $0x2] sm:$0x3] %vm35_vm0, %v345_v36  ;;  %v88_v48 = vand.u32 127, %v87_v46 }
   0x9   :  { %68 = vadd.xlane.f32.xlu1 %v67_v3  ;;  %v41_v10 = vld [vmem:[#allocation3 + $0x18] sm:$0xff]  ;;  %v70_v11 = vadd.f32 %v49_v8, %v48_v7  ;;  %v43_v15 = vld [vmem:[#allocation3 + $0x28] sm:$0xff]  ;;  %v131_v16 = vmax.f32 %v48_v7, %v49_v8  ;;  %v50_v19 = vld [vmem:[#allocation3 + $0x60] sm:$0xff]  ;;  %vm92_vm1 = vcmask 130112   ;;  %vm96_vm2 = vcmask 195712   ;;  %s264_s30 = sshll.u32 %s411_s3, 4  ;;  %s265_s30 = int_to_ptr.hbm [resolvable:$true] %s264_s30 }
   0xa   :  { %117 = vmax.xlane.f32.xlu2 %v116_v5  ;;  %56 = vadd.xlane.f32.xlu0 %v55_v6  ;;  %v119_v12 = vmax.f32 %v40_v9, %v41_v10  ;;  %v58_v13 = vadd.f32 %v41_v10, %v40_v9  ;;  %v61_v17 = vadd.f32 %v43_v15, %v42_v14  ;;  %v51_v20 = vld [vmem:[#allocation3 + $0x68] sm:$0xff]  ;;  %v52_v24 = vld [vmem:[#allocation3 + $0x70] sm:$0xff]  ;;  %v53_v25 = vld [vmem:[#allocation3 + $0x78] sm:$0xff]  ;;  %v90_v50 = vadd.s32 4294967288, %v88_v48 }
   0xb   :  { %v122_v21 = vmax.f32 %v42_v14, %v43_v15  ;;  %v134_v22 = vmax.f32 %v50_v19, %v51_v20  ;;  %v73_v23 = vadd.f32 %v51_v20, %v50_v19  ;;  %v44_v26 = vld [vmem:[#allocation3 + $0x30] sm:$0xff]  ;;  %v45_v27 = vld [vmem:[#allocation3 + $0x38] sm:$0xff]  ;;  %v76_v28 = vadd.f32 %v53_v25, %v52_v24  ;;  %v176_v45 = vld [vmem:[%s409_s1 + $0x8] sm:$0xff] }
   0xc   :  { %v125_v29 = vmax.f32 %v44_v26, %v45_v27  ;;  %v64_v30 = vadd.f32 %v45_v27, %v44_v26  ;;  %v137_v31 = vmax.f32 %v52_v24, %v53_v25  ;;  %v178_v41 = vld [vmem:[%s409_s1 + $0x18] sm:$0xff]  ;;  %v177_v42 = vld [vmem:[%s409_s1 + $0x10] sm:$0xff]  ;;  %v175_v47 = vld [vmem:[%s409_s1] sm:$0xff]  ;;  %v94_v52 = vadd.s32 4294967280, %v88_v48 }
   0xd   :  { %195 = vmatpush.msra.mxu0 %v178_v41  ;;  %v98_v56 = vadd.s32 4294967272, %v88_v48  ;;  %vm100_vm3 = vcmask 261312   ;;  %vm109_vm4 = vcmask 1041409   ;;  %vm179_vm6 = vcmask 261120  }
   0xe   :  { %v54_v6 = vld [vmem:[#allocation2] sm:$0x3]  ;;  %vm209_vm7 = vcmask 1041408   ;;  %vm205_vm8 = vcmask 15360  }
   0xf   :  { %196 = vmatpush.msra.mxu0 %v177_v42  ;;  %v115_v24 = vld [vmem:[#allocation2 + $0x2] sm:$0x3] }
  0x11   :  { %71 = vadd.xlane.f32.xlu1 %v70_v11  ;;  %197 = vmatpush.msra.mxu0 %v176_v45 }
  0x12   :  { %120 = vmax.xlane.f32.xlu2 %v119_v12  ;;  %59 = vadd.xlane.f32.xlu0 %v58_v13 }
  0x13   :  { %198 = vmatpush.msra.mxu0 %v175_v47 }
  0x19   :  { %132 = vmax.xlane.f32.xlu1 %v131_v16 }
  0x1a   :  { %62 = vadd.xlane.f32.xlu2 %v61_v17  ;;  %129 = vmax.xlane.f32.xlu0 %v128_v18 }
  0x21   :  { %123 = vmax.xlane.f32.xlu1 %v122_v21 }
  0x22   :  { %135 = vmax.xlane.f32.xlu2 %v134_v22  ;;  %74 = vadd.xlane.f32.xlu0 %v73_v23 }
  0x29   :  { %77 = vadd.xlane.f32.xlu1 %v76_v28 }
  0x2a   :  { %126 = vmax.xlane.f32.xlu2 %v125_v29  ;;  %65 = vadd.xlane.f32.xlu0 %v64_v30  ;;  %v171_v29 = vshrl.u32 %v87_v46, 7  ;;  %v346_v30 = vmov 1.0  }
  0x2c   :  { %vm172_vm5 = vcmp.lt.s32.totalorder %v171_v29, 2 }
  0x32   :  { %138 = vmax.xlane.f32.xlu0 %v137_v31  ;;  %v173_v31 = vsel %vm172_vm5, 0.00390625, %v346_v30 }
  0x7c   :  { %v69_v33 = vpop.xlane.xlu1 %68 }
  0x7d   :  { %v118_v34 = vpop.xlane.xlu2 %117  ;;  %v57_v35 = vpop.xlane.xlu0 %56  ;;  %v102_v54 = vperm.slane %v69_v33, %v88_v48 }
  0x7e   :  { %v89_v60 = vperm.slane %v57_v35, %v88_v48  ;;  %v148_v8 = vperm.slane %v118_v34, %v88_v48  ;;  %v204_v34 = vld [vmem:[%s410_s2] sm:$0x3]  ;;  %s347_s2 = smov [#allocation6]  }
  0x7f   :  { %275 = vmatpush.msk.msra.mxu1 %vm209_vm7, %v204_v34  ;;  %s262_s27 = sshll.u32 %s347_s2, 4  ;;  %s263_s27 = int_to_ptr.vmem [resolvable:$true] %s262_s27 }
  0x84   :  { %v72_v37 = vpop.xlane.xlu1 %71 }
  0x85   :  { %v121_v38 = vpop.xlane.xlu2 %120  ;;  %v60_v39 = vpop.xlane.xlu0 %59  ;;  %v103_v55 = vperm.slane %v72_v37, %v90_v50 }
  0x86   :  { %v91_v57 = vperm.slane %v60_v39, %v90_v50  ;;  %v149_v11 = vperm.slane %v121_v38, %v90_v50 }
  0x87   :  { %v104_v62 = vsel %vm92_vm1, %v103_v55, %v102_v54 }
  0x88   :  { %v93_v1 = vsel %vm92_vm1, %v91_v57, %v89_v60  ;;  %v150_v19 = vsel %vm92_vm1, %v149_v11, %v148_v8 }
  0x8c   :  { %v133_v40 = vpop.xlane.xlu1 %132 }
  0x8d   :  { %v63_v43 = vpop.xlane.xlu2 %62  ;;  %v130_v44 = vpop.xlane.xlu0 %129  ;;  %v156_v12 = vperm.slane %v133_v40, %v90_v50 }
  0x8e   :  { %v95_v59 = vperm.slane %v63_v43, %v94_v52  ;;  %v155_v13 = vperm.slane %v130_v44, %v88_v48 }
  0x90   :  { %v97_v4 = vsel %vm96_vm2, %v95_v59, %v93_v1  ;;  %v157_v20 = vsel %vm92_vm1, %v156_v12, %v155_v13 }
  0x94   :  { %v124_v49 = vpop.xlane.xlu1 %123 }
  0x95   :  { %v75_v51 = vpop.xlane.xlu0 %74  ;;  %v136_v53 = vpop.xlane.xlu2 %135  ;;  %v151_v15 = vperm.slane %v124_v49, %v94_v52 }
  0x96   :  { %v105_v58 = vperm.slane %v75_v51, %v94_v52  ;;  %v158_v16 = vperm.slane %v136_v53, %v94_v52 }
  0x97   :  { %v152_v22 = vsel %vm96_vm2, %v151_v15, %v150_v19 }
  0x98   :  { %v106_v2 = vsel %vm96_vm2, %v105_v58, %v104_v62  ;;  %v159_v23 = vsel %vm96_vm2, %v158_v16, %v157_v20 }
  0x9c   :  { %v78_v61 = vpop.xlane.xlu1 %77 }
  0x9d   :  { %v107_v63 = vperm.slane %v78_v61, %v98_v56  ;;  %v66_v0 = vpop.xlane.xlu0 %65  ;;  %v127_v9 = vpop.xlane.xlu2 %126 }
  0x9e   :  { %v99_v3 = vperm.slane %v66_v0, %v98_v56  ;;  %v153_v17 = vperm.slane %v127_v9, %v98_v56 }
  0x9f   :  { %v108_v5 = vsel %vm100_vm3, %v107_v63, %v106_v2 }
  0xa0   :  { %v101_v7 = vsel %vm100_vm3, %v99_v3, %v97_v4  ;;  %v154_v25 = vsel %vm100_vm3, %v153_v17, %v152_v22 }
  0xa1   :  { %v110_v10 = vsel %vm109_vm4, %v108_v5, %v101_v7 }
  0xa2   :  { %v112_v14 = vadd.f32 %v110_v10, %v54_v6 }
  0xa4   :  { %114 = vst.msk [vmem:[#allocation2] sm:$0x3] %vm35_vm0, %v112_v14 }
  0xa5   :  { %v139_v18 = vpop.xlane.xlu0 %138 }
  0xa6   :  { %v160_v21 = vperm.slane %v139_v18, %v98_v56 }
  0xa8   :  { %v161_v26 = vsel %vm100_vm3, %v160_v21, %v159_v23 }
  0xa9   :  { %v162_v27 = vsel %vm109_vm4, %v161_v26, %v154_v25 }
  0xaa   :  { %v164_v28 = vmax.f32 %v115_v24, %v162_v27 }
  0xac   :  { %165 = vst.msk [vmem:[#allocation2 + $0x2] sm:$0x3] %vm35_vm0, %v164_v28 }
  0xb3   :  { %v169_v32 = vld [vmem:[#allocation2] sm:$0xf] }
  0xb4   :  { %v174_v33 = vmul.f32 %v173_v31, %v169_v32 }
  0xb6   :  { %274 = vmatmul.msk.f32.vlgmr.msra.gmra.mxu0 %vm179_vm6, %v174_v33 }
 0x133   :  { %v200_v35 = vpop.f32.mrf.mxu0 }
 0x134   :  { %v203_v36 = vmax.f32 %v200_v35, 0.0 }
 0x136   :  { %276 = vmatmul.msk.f32.vlgmr.msra.gmra.mxu1 %vm205_vm8, %v203_v36 }
 0x1b3   :  { %v230_v37 = vpop.f32.mrf.mxu1 }
 0x1b4   :  { %v234_v38 = vrot.slane %v230_v37, 2 }
 0x1b6   :  { %v236_v39 = vadd.f32 %v234_v38, %v230_v37 }
 0x1b8   :  { %v277_v40 = vmul.f32 -1.442695, %v236_v39 }
 0x1ba   :  { %285 = vpow2.f32 %v277_v40 }
 0x1c0   :  { %v286_v41 = vpop.eup %285 }
 0x1c1   :  { %v240_v42 = vadd.f32 1.0, %v286_v41 }
 0x1c3   :  { %287 = vrcp.f32 %v240_v42  ;;  %v252_v46 = vand.u32 2147483648, %v240_v42  ;;  %v250_v48 = vand.u32 2147483647, %v240_v42  ;;  %vm246_vm10 = vweird.f32 %v240_v42 }
 0x1c5   :  { %v253_v50 = vor.u32 1.1754944e-38, %v252_v46  ;;  %vm251_vm12 = vcmp.eq.f32.partialorder %v250_v48, 8.507059e+37 }
 0x1c9   :  { %v288_v43 = vpop.eup %287 }
 0x1ca   :  { %v242_v44 = vmul.f32 %v288_v43, %v240_v42  ;;  %vm247_vm9 = vweird.f32 %v288_v43 }
 0x1cb   :  { %vm248_vm11 = vmor %vm246_vm10, %vm247_vm9 }
 0x1cc   :  { %v243_v45 = vsub.f32 1.0, %v242_v44 }
 0x1ce   :  { %v244_v47 = vmul.f32 %v288_v43, %v243_v45 }
 0x1d0   :  { %v245_v49 = vadd.f32 %v288_v43, %v244_v47 }
 0x1d2   :  { %v249_v51 = vsel %vm248_vm11, %v288_v43, %v245_v49 }
 0x1d3   :  { %v254_v52 = vsel %vm251_vm12, %v253_v50, %v249_v51 }
 0x1d4   :  { %256 = vst.msk [vmem:[#allocation6] sm:$0x3] %vm35_vm0, %v254_v52 }
 0x1d5   :  { %267 = dma.vmem_to_hbm [thread:$0]  %s263_s27, 32, %s265_s30, [#allocation5]  }
 0x1d6   :  { %339 = dma.done.wait [#allocation5], 32  }
 0x1d7   :  { %340 = vsyncadd [#allocation5], 4294967264 }
 0x1d8   :  { %272 = vsyncpa [#allocation4], 1 }
 0x1d9   :  { %273 = vsyncpa [#allocation5], 1 }

</bundles_post_ra>
